<compile_context>
chip_gen: v7x
topology: tpu7x:2x2x1
jax: 0.10.0
libtpu: 0.0.40
codegen_flags: <defaults>
</compile_context>

<pallas_src>
import jax
import jax.numpy as jnp
from jax.experimental import pallas as pl
from jax.experimental.pallas import tpu as pltpu


def _round_up(x, m):
    return (x + m - 1) // m * m


def _pick_batch_tile(B, C, itemsize, block_budget):
    # Largest divisor of B (<= 8) whose minimum (128-lane) snd block fits the
    # per-block byte budget.  The leading block dim has no (8,128) constraint.
    for bt in range(min(B, 8), 0, -1):
        if B % bt == 0 and bt * C * 128 * itemsize <= block_budget:
            return bt
    return 1


def _pick_hw_tile(hw_pad, lanes_budget):
    # hw_pad is a multiple of 128: pick the largest 128-multiple divisor of
    # hw_pad within the lane budget, preferring one that leaves >= 2 blocks
    # (so both v7x TensorCores get HW-axis work).
    n = hw_pad // 128
    divs = [d for d in range(1, n + 1) if n % d == 0 and d * 128 <= lanes_budget]
    if not divs:
        return 128
    two_block = [d for d in divs if n // d >= 2]
    return 128 * (max(two_block) if two_block else max(divs))


def _bias_bmm_kernel(img_ref, snd_ref, bias_ref, out_ref):
    # img_ref:  (Bt, C, 1)   image features for this batch tile (native dtype)
    # snd_ref:  (Bt, C, T)   sound feature tile: C on sublanes, HW on lanes
    # bias_ref: (1,)         scalar bias in SMEM (f32)
    # out_ref:  (1, Bt, T)   dense (Bt, T) output slab
    prod = img_ref[...] * snd_ref[...]                 # native-dtype VPU multiply
    z = jnp.sum(prod, axis=1, dtype=jnp.float32)       # f32 C (sublane) reduce -> (Bt, T)
    out_ref[...] = (z + bias_ref[0]).astype(out_ref.dtype)[None]


def bias_forward(feat_img, feat_sound, bias, *,
                 target_block_bytes=4 << 20, min_pallas_bytes=256 << 10):
    """Bias.forward: bmm(feat_img.view(B,1,C), feat_sound.view(B,C,HW)) + bias -> (B,1,H,W)."""
    B, C, H, W = feat_sound.shape
    HW = H * W
    out_dtype = jnp.result_type(feat_img.dtype, feat_sound.dtype)
    itemsize = jnp.dtype(feat_sound.dtype).itemsize
    bias_f32 = jnp.asarray(bias, jnp.float32).reshape(())

    # Small-problem fast path: launch + tiling overhead dominates for tiny inputs.
    if B * C * HW * itemsize < min_pallas_bytes:
        z = jnp.einsum("bc,bchw->bhw", feat_img, feat_sound,
                       preferred_element_type=jnp.float32)
        return (z[:, None, :, :] + bias_f32).astype(out_dtype)

    tb = min(int(target_block_bytes), 8 << 20)

    # ---- tiling -------------------------------------------------------------
    Bt = _pick_batch_tile(B, C, itemsize, tb)
    lanes_budget = max(128, (tb // max(Bt * C * itemsize, 1)) // 128 * 128)

    snd = feat_sound.reshape(B, C, HW)
    if HW % 128 == 0:
        HW_pad = HW                                    # already lane-aligned: no pad
        T = _pick_hw_tile(HW_pad, lanes_budget)
    elif Bt * C * HW * itemsize <= tb:
        HW_pad = HW                                    # single full-extent lane block, no pad
        T = HW
    else:
        HW_pad = _round_up(HW, 128)                    # pad only to the next 128 multiple
        snd = jnp.pad(snd, ((0, 0), (0, 0), (0, HW_pad - HW)))
        T = _pick_hw_tile(HW_pad, lanes_budget)

    img = feat_img.reshape(B, C, 1)                    # free reshape (trailing size-1 dim)
    bias1 = bias_f32.reshape(1)
    nB = B // Bt
    grid = (nB, HW_pad // T)                           # HW innermost: img block re-used

    # VMEM budget: double-buffered DMA blocks + worst-case in-kernel f32 temporaries.
    in_blk = Bt * C * T * itemsize
    img_blk = Bt * C * itemsize
    out_blk = Bt * T * jnp.dtype(out_dtype).itemsize
    f32_tmp = Bt * C * T * 4 + Bt * T * 4
    vmem_needed = 2 * (in_blk + img_blk + out_blk) + f32_tmp + (2 << 20)
    vmem_limit = int(min(max(vmem_needed, 16 << 20), 48 << 20))

    out = pl.pallas_call(
        _bias_bmm_kernel,
        out_shape=jax.ShapeDtypeStruct((nB, Bt, HW_pad), out_dtype),
        grid_spec=pltpu.PrefetchScalarGridSpec(
            num_scalar_prefetch=0,
            grid=grid,
            in_specs=[
                pl.BlockSpec((Bt, C, 1), lambda b, l: (b, 0, 0)),    # feat_img
                pl.BlockSpec((Bt, C, T), lambda b, l: (b, 0, l)),    # feat_sound
                pl.BlockSpec(memory_space=pltpu.MemorySpace.SMEM),   # bias scalar
            ],
            out_specs=pl.BlockSpec((1, Bt, T), lambda b, l: (b, 0, l)),
        ),
        compiler_params=pltpu.CompilerParams(
            dimension_semantics=("parallel", "parallel"),
            vmem_limit_bytes=vmem_limit,
        ),
    )(img, snd, bias1)

    out = out.reshape(B, HW_pad)
    if HW_pad != HW:
        out = out[:, :HW]
    return out.reshape(B, 1, H, W)


def bias_reference(feat_img, feat_sound, bias):
    # Pure-JAX reference mirroring the PyTorch forward.
    z = jnp.einsum("bc,bchw->bhw", feat_img.astype(jnp.float32),
                   feat_sound.astype(jnp.float32))
    return z[:, None, :, :] + jnp.asarray(bias, jnp.float32).reshape(())


if __name__ == "__main__":
    key = jax.random.PRNGKey(0)
    k_img, k_snd = jax.random.split(key)

    configs = [
        # (B, C, H, W, wrapper kwargs)
        (2, 4, 16, 16, dict()),                          # tiny -> fast einsum path
        (2, 4, 16, 16, dict(min_pallas_bytes=0)),        # force kernel: 128-aligned HW
        (3, 48, 24, 40, dict()),                         # unaligned HW, single lane block
        (3, 48, 24, 40, dict(min_pallas_bytes=0,
                             target_block_bytes=64 << 10)),  # pad-to-128 + multi-tile path
    ]

    for B, C, H, W, kwargs in configs:
        feat_img = jax.random.normal(k_img, (B, C), dtype=jnp.float32)
        feat_sound = jax.random.normal(k_snd, (B, C, H, W), dtype=jnp.float32)

        # Parameter init matching nn.Parameter(torch.zeros(1)), plus a nonzero
        # value to exercise the bias-add path.
        for bias_val in (0.0, 0.5):
            bias = jnp.full((1,), bias_val, dtype=jnp.float32)

            z = jax.block_until_ready(bias_forward(feat_img, feat_sound, bias, **kwargs))
            z_ref = bias_reference(feat_img, feat_sound, bias)

            assert z.shape == (B, 1, H, W), z.shape
            assert jnp.allclose(z, z_ref, atol=1e-4, rtol=1e-4), (
                f"mismatch vs reference for shape {(B, C, H, W)} kwargs={kwargs}")

    print("KERNEL_OK")
</pallas_src>

<mosaic_0001>
module attributes {stable_mosaic.version = 11 : i64} {
  func.func @_bias_bmm_kernel(%arg0: i32, %arg1: i32, %arg2: memref<2x4x1xf32, #tpu.memory_space<vmem>>, %arg3: memref<2x4x128xf32, #tpu.memory_space<vmem>>, %arg4: memref<1xf32, #tpu.memory_space<smem>>, %arg5: memref<1x2x128xf32, #tpu.memory_space<vmem>>) attributes {dimension_semantics = [#tpu.dimension_semantics<parallel>, #tpu.dimension_semantics<parallel>], iteration_bounds = array<i64: 1, 2>, scalar_prefetch = 0 : i64, scratch_operands = 0 : i64, tpu.core_type = #tpu.core_type<tc>, window_params = [{transform_indices = @transform_0, window_bounds = array<i64: 2, 4, 1>}, {transform_indices = @transform_1, window_bounds = array<i64: 2, 4, 128>}, {transform_indices = @transform_2, window_bounds = array<i64: 1>}, {transform_indices = @transform_3, window_bounds = array<i64: 1, 2, 128>}]} {
    %c0 = arith.constant 0 : index
    %c0_0 = arith.constant 0 : index
    %c0_1 = arith.constant 0 : index
    %0 = vector.load %arg2[%c0, %c0_0, %c0_1] : memref<2x4x1xf32, #tpu.memory_space<vmem>>, vector<2x4x1xf32>
    %c0_2 = arith.constant 0 : index
    %c0_3 = arith.constant 0 : index
    %c0_4 = arith.constant 0 : index
    %1 = vector.load %arg3[%c0_2, %c0_3, %c0_4] : memref<2x4x128xf32, #tpu.memory_space<vmem>>, vector<2x4x128xf32>
    %2 = vector.broadcast %0 : vector<2x4x1xf32> to vector<2x4x128xf32>
    %3 = arith.mulf %2, %1 : vector<2x4x128xf32>
    %cst = arith.constant dense<0.000000e+00> : vector<2x128xf32>
    %4 = vector.multi_reduction <add>, %3, %cst [1] : vector<2x4x128xf32> to vector<2x128xf32>
    %c0_5 = arith.constant 0 : index
    %5 = memref.load %arg4[%c0_5] : memref<1xf32, #tpu.memory_space<smem>>
    %6 = vector.broadcast %5 : f32 to vector<2x128xf32>
    %7 = arith.addf %4, %6 : vector<2x128xf32>
    %8 = vector.shape_cast %7 : vector<2x128xf32> to vector<1x2x128xf32>
    %c0_6 = arith.constant 0 : index
    %c0_7 = arith.constant 0 : index
    %c0_8 = arith.constant 0 : index
    %9 = vector.load %arg5[%c0_6, %c0_7, %c0_8] : memref<1x2x128xf32, #tpu.memory_space<vmem>>, vector<1x2x128xf32>
    tpu.vector_store %arg5[%c0_6, %c0_7, %c0_8], %8 {strides = array<i32>} : memref<1x2x128xf32, #tpu.memory_space<vmem>>, vector<1x2x128xf32>,
    return
  }
  func.func @transform_0(%arg0: i32, %arg1: i32) -> (i32, i32, i32) {
    %c0_i32 = arith.constant 0 : i32
    %c0_i32_0 = arith.constant 0 : i32
    %c0_i32_1 = arith.constant 0 : i32
    return %arg0, %c0_i32, %c0_i32_0 : i32, i32, i32
  }
  func.func @transform_1(%arg0: i32, %arg1: i32) -> (i32, i32, i32) {
    %c0_i32 = arith.constant 0 : i32
    %c0_i32_0 = arith.constant 0 : i32
    return %arg0, %c0_i32, %arg1 : i32, i32, i32
  }
  func.func @transform_2(%arg0: i32, %arg1: i32) -> i32 {
    %c0_i32 = arith.constant 0 : i32
    %c0_i32_0 = arith.constant 0 : i32
    return %c0_i32 : i32
  }
  func.func @transform_3(%arg0: i32, %arg1: i32) -> (i32, i32, i32) {
    %c0_i32 = arith.constant 0 : i32
    %c0_i32_0 = arith.constant 0 : i32
    return %arg0, %c0_i32, %arg1 : i32, i32, i32
  }
}

</mosaic_0001>

<bundles_post_ra>
// kernel: tpu_custom_call.1
= control target key start
LH: loop header
LB: loop body
LE: loop exit
PB: predicated region body
PF: predicated region fallthrough
CT: control target
= control target key end

     0   :  { %s710_s0 = inlined_call_operand.vmem [shape: f32[2,4,1], index: 0, kind: input, shape index: {}]   ;;  %s711_s1 = inlined_call_operand.vmem [shape: f32[2,4,256], index: 1, kind: input, shape index: {}]   ;;  %s712_s2 = inlined_call_operand.<no memory space> [shape: f32[1], index: 2, kind: input, shape index: {}]   ;;  %s713_s3 = inlined_call_operand.hbm [shape: f32[1,2,256], index: 3, kind: output, shape index: {}]  }
   0x1   :  { %8 = sst [smem:[#allocation2]] %s712_s2 }
   0x2   :  { %9 = vsyncpa [#allocation5], 0 }
   0x3   :  { %11 = vsyncpa [#allocation5 + $0x1], 0  ;;  %s582_s14 = smov 0   ;;  %s584_s15 = smov 0  }
   0x4   :  { %s586_s16 = smov 0   ;;  %s588_s17 = smov 0  }
   0x5   :  { %s590_s18 = smov 0   ;;  %s592_s19 = smov 0  }
   0x6 LB: > { %s406_s2 = sadd.s32 4294967295, %s555_s19   ;;  %s407_s20 = sadd.s32 4294967294, %s555_s19   ;;  %s555_s19 = sphi %s592_s19, %s17_s19   ;;  %s551_s18 = sphi %s590_s18, %s720_s18   ;;  %s547_s17 = sphi %s588_s17, %s719_s17   ;;  %s543_s16 = sphi %s586_s16, %s718_s16   ;;  %s539_s15 = sphi %s584_s15, %s717_s15   ;;  %s535_s14 = sphi %s582_s14, %s716_s14  }
   0x7   : > { %s26_s21 = sadd.s32 1, %s551_s18  ;;  %s64_s22 = sadd.s32 1, %s543_s16 }
   0x8   : > { %p27_p0 = scmp.ge.s32.totalorder %s26_s21, 2  ;;  %p71_p1 = scmp.ne.s32.totalorder %s543_s16, %s539_s15 }
   0x9   : > { %p72_p2 = scmp.eq.s32.totalorder %s555_s19, 0  ;;  %p124_p3 = scmp.eq.s32.totalorder %s406_s2, 1 }
   0xa   : > { %s722_s21 = smov (%p27_p0, %s26_s21), 0  ;;  %p129_p6 = scmp.ne.s32.totalorder %s539_s15, %s535_s14 }
   0xb   : > { %p73_p4 = por %p72_p2, %p71_p1  ;;  %p621_p5 = por %p124_p3, %p71_p1 }
   0xc   : > { %s60_s24 = ssub.s32 %s551_s18, %s722_s21  ;;  %p130_p8 = scmp.eq.s32.totalorder %s407_s20, 1 }
   0xd   : > { %p62_p7 = scmp.eq.s32.totalorder %s60_s24, 0  ;;  %p410_p10 = scmp.ge.s32.totalorder %s555_s19, 2 }
   0xe   : > { %p632_p9 = por %p130_p8, %p129_p6 }
   0xf   : > { %s630_s25 = scalar_select %p62_p7, %s543_s16, %s64_s22  }
  0x10   : > { %158 = sbr.rel (%p410_p10) target bundleno = 30 (0x1e), region = 24 }
  0x17   : > { %161 = sbr.rel (!%p73_p4) target bundleno = 30 (0x1e), region = 28  ;;  %s163_s27 = sand.u32 (%p73_p4), 1, %s543_s16  }
  0x18   : > { %s412_s28 = sshll.u32 (%p73_p4), %s551_s18, 2  ;;  %s411_s29 = sshll.u32 (%p73_p4), %s163_s27, 3 }
  0x19   : > { %s170_s5 = scalar_lea.vmem (%p73_p4), %s711_s1, %s412_s28  ;;  %s165_s6 = scalar_lea.vmem (%p73_p4), [#allocation3], %s411_s29 }
  0x1a   : > { %v186_v0 = vld [vmem:[%s170_s5] sm:$0xf] (%p73_p4)  ;;  %v188_v1 = vld [vmem:[%s170_s5 + $0x8] sm:$0xf] (%p73_p4) }
  0x1b   : > { %187 = vst [vmem:[%s165_s6] sm:$0xf] (%p73_p4), %v186_v0  ;;  %189 = vst [vmem:[%s165_s6 + $0x4] sm:$0xf] (%p73_p4), %v188_v1 }
  0x1e PF: > { %p413_p11 = scmp.ge.s32.totalorder %s555_s19, 1  ;;  %p215_p12 = scmp.lt.s32.totalorder %s555_s19, 3 }
  0x20   : > { %p216_p13 = pnand %p413_p11, %p215_p12 }
  0x21   : > { %v257_v2 = vld [vmem:[%s710_s0] sm:$0xf] (!%p216_p13)  ;;  %v557_v3 = vmov (!%p216_p13), 0   ;;  %v258_v4 = vld [vmem:[%s710_s0 + $0x4] sm:$0xf] (!%p216_p13)  ;;  %s653_s11 = sand.u32 (!%p216_p13), 1, %s539_s15  }
  0x22   : > { %219 = sbr.rel (%p216_p13) target bundleno = 199 (0xc7), region = 69  ;;  %476 = vset.pattern.permute.xlu0 (!%p216_p13), %v557_v3  ;;  %s414_s12 = sshll.u32 (!%p216_p13), %s653_s11, 3  ;;  %vm273_vm0 = vcmask (!%p216_p13), 1043456   ;;  %vm294_vm1 = vcmask (!%p216_p13), 1041409  }
  0x23   : > { %263 = vperm.xlu0 (!%p216_p13), %476, %v257_v2   ;;  %s224_s13 = scalar_lea.vmem (!%p216_p13), [#allocation3], %s414_s12  ;;  %s288_s2 = sld [smem:[#allocation2]] (!%p216_p13) }
  0x24   : > { %v259_v5 = vld [vmem:[%s224_s13] sm:$0xf] (!%p216_p13)  ;;  %v260_v8 = vld [vmem:[%s224_s13 + $0x4] sm:$0xf] (!%p216_p13)  ;;  %s415_s20 = sshll.u32 (!%p216_p13), %s653_s11, 1  ;;  %s417_s22 = sshll.u32 (!%p216_p13), %s547_s17, 5 }
  0x25   : > { %s249_s24 = scalar_lea.vmem (!%p216_p13), [#allocation4], %s415_s20  ;;  %s661_s30 = scalar_lea.hbm (!%p216_p13), %s713_s3, %s417_s22 }
  0x26   : > { %s314_s27 = sshll.u32 (!%p216_p13), %s249_s24, 4  ;;  %s299_s4 = scalar_lea.sflag (!%p216_p13), [#allocation5], %s653_s11  ;;  %s663_s27 = int_to_ptr.vmem [resolvable:$true] %s314_s27 }
  0x27   : > { %268 = vperm.xlu0 (!%p216_p13), %476, %v258_v4   ;;  %s477_s5 = scalar_lea.vmem (!%p216_p13), %s663_s27, 32  ;;  %s558_s17 = smov (!%p216_p13), [#allocation4]  }
  0x28   : > { %p478_p0 = scmp.ne.s32.totalorder (!%p216_p13), %s663_s27, %s477_s5  ;;  %s481_s6 = sshll.u32 (!%p216_p13), %s558_s17, 4  ;;  %s482_s6 = int_to_ptr.vmem [resolvable:$false] %s481_s6 }
  0x29   : > { %v289_v24 = vstv %s288_s2  ;;  %s483_s7 = scalar_lea.vmem %s482_s6, 64  ;;  %p484_p3 = scmp.lt.s32.totalorder %s663_s27, %s482_s6 }
  0x2a   : > { %p479_p1 = pnand %p478_p0, %p621_p5  ;;  %p485_p4 = scmp.lt.s32.totalorder %s483_s7, %s477_s5 }
  0x2c   : > { %p480_p2 = pneg %p479_p1  ;;  %p486_p6 = por %p485_p4, %p484_p3 }
  0x2e   : > { %p487_p7 = pnand %p486_p6, %p480_p2 }
  0xa2   : > { %v264_v6 = vpop.permute.xlu0 %263 }
  0xa3   : > { %v271_v7 = vmul.f32 %v264_v6, %v259_v5 }
  0xa5   : > { %v274_v9 = vsel %vm273_vm0, %v271_v7, 0.0 }
  0xa6   : > { %v275_v10 = vrot.slane %v274_v9, 4  ;;  %v269_v11 = vpop.permute.xlu0 %268 }
  0xa7   : > { %v272_v12 = vmul.f32 %v269_v11, %v260_v8 }
  0xa8   : > { %v276_v13 = vadd.f32 %v275_v10, %v274_v9 }
  0xa9   : > { %v281_v14 = vsel %vm273_vm0, %v272_v12, 0.0 }
  0xaa   : > { %v277_v15 = vrot.slane %v276_v13, 2  ;;  %v282_v16 = vrot.slane %v281_v14, 4 }
  0xac   : > { %v278_v17 = vadd.f32 %v277_v15, %v276_v13  ;;  %v283_v18 = vadd.f32 %v282_v16, %v281_v14 }
  0xae   : > { %v279_v19 = vrot.slane %v278_v17, 1  ;;  %v284_v20 = vrot.slane %v283_v18, 2 }
  0xb0   : > { %v285_v21 = vadd.f32 %v284_v20, %v283_v18  ;;  %v280_v22 = vadd.f32 %v279_v19, %v278_v17 }
  0xb2   : > { %v286_v23 = vrot.slane %v285_v21, 1  ;;  %v290_v26 = vadd.f32 %v289_v24, %v280_v22 }
  0xb4   : > { %v287_v25 = vadd.f32 %v286_v23, %v285_v21 }
  0xb6   : > { %v291_v27 = vadd.f32 %v289_v24, %v287_v25 }
  0xb8   : > { %v295_v28 = vsel %vm294_vm1, %v291_v27, %v290_v26 }
  0xb9   : > { %297 = vst [vmem:[%s249_s24] sm:$0x3] %v295_v28 }
  0xba   : > { %490 = shalt.err (!%p487_p7)
}
  0xbb   : > { %s491_s8 = scalar_lea.hbm %s661_s30, 32  ;;  %s495_s11 = scalar_lea.hbm %s713_s3, 64 }
  0xbc   : > { %p492_p8 = scmp.ne.s32.totalorder %s661_s30, %s491_s8  ;;  %p496_p13 = scmp.lt.u32.totalorder %s661_s30, %s713_s3 }
  0xbd   : > { %p497_p0 = scmp.lt.u32.totalorder %s495_s11, %s491_s8  ;;  %p499_p2 = scmp.lt.u32.totalorder %s491_s8, %s661_s30 }
  0xbe   : > { %p493_p11 = pnand %p492_p8, %p621_p5 }
  0xbf   : > { %p498_p1 = por %p497_p0, %p496_p13 }
  0xc0   : > { %p494_p12 = pneg %p493_p11 }
  0xc1   : > { %p500_p3 = por %p499_p2, %p498_p1 }
  0xc3   : > { %p501_p4 = pnand %p500_p3, %p494_p12 }
  0xc5   : > { %504 = shalt.err (!%p501_p4)
}
  0xc6   : > { %420 = dma.vmem_to_hbm [thread:$0]  (%p621_p5), %s663_s27, 32, %s661_s30, %s299_s4  }
  0xc7 PF: > { %s326_s2 = sand.u32 1, %s535_s14   ;;  %p423_p6 = pnand %p410_p10, %p632_p9 }
  0xc8   : > { %s327_s20 = scalar_lea.sflag [#allocation5], %s326_s2 }
  0xc9   : > { %530 = dma.done.wait (!%p423_p6), %s327_s20, 32  }
  0xca   : > { %532 = vsyncadd (!%p423_p6), %s327_s20, 4294967264  ;;  %s17_s19 = sadd.s32 1, %s555_s19   ;;  %s716_s14 = smov %s539_s15 }
  0xcb   : > { %p14_p7 = scmp.ge.s32.totalorder %s17_s19, 4   ;;  %s717_s15 = smov %s543_s16 }
  0xcc   : > { %s718_s16 = smov %s630_s25  ;;  %s719_s17 = smov %s551_s18 }
  0xcd   : > { %s720_s18 = smov %s722_s21  ;;  %16 = sbr.rel (!%p14_p7) target bundleno = 6 (0x6), region = 116 }
  0xd4   :  { %332 = vsyncpa [#allocation5], 1 }
  0xd5   :  { %334 = vsyncpa [#allocation5 + $0x1], 1 }

</bundles_post_ra>
